<compile_context>
chip_gen: v7x
topology: tpu7x:2x2x1
jax: 0.10.0
libtpu: 0.0.40
codegen_flags: <defaults>
</compile_context>

<pallas_src>
import functools

import numpy as np
import jax
import jax.numpy as jnp
from jax.experimental import pallas as pl
from jax.experimental.pallas import tpu as pltpu

EPS = 1e-5


# --------------------- pass 1: conv-as-matmul (channel-major) + BN partial stats ---------------------
def _conv_stats_kernel(p_ref, w_ref, y_ref, st_ref, *, B):
    """p_ref  : (B, K*K*Cin, Ho*Wo)  bf16 im2col patches (ReLU already applied)
       w_ref  : (Cout, K*K*Cin)      bf16 conv weight, row order = (cin, kh, kw) flattened
       y_ref  : (B, Cout, Ho*Wo)     f32 conv output (flattened NCHW -- zero relayout)
       st_ref : (1, Cout, 2)         f32 per-step [sum, sum_of_squares] over (B*Ho*Wo)
    """
    cout = w_ref.shape[0]
    s1 = jnp.zeros((cout, 1), jnp.float32)
    s2 = jnp.zeros((cout, 1), jnp.float32)
    for b in range(B):                                    # static unroll, B is tiny
        y = jnp.dot(w_ref[...], p_ref[b],                 # (Cout, Ho*Wo) on the MXU, f32 acc
                    preferred_element_type=jnp.float32)
        y_ref[b] = y
        s1 = s1 + jnp.sum(y, axis=1, keepdims=True)       # cross-lane reduce -> per-sublane col
        s2 = s2 + jnp.sum(y * y, axis=1, keepdims=True)
    st_ref[...] = jnp.concatenate([s1, s2], axis=1)[None]  # (1, Cout, 2)


# --------------------- pass 2: BN finalize (tiny, per-step) + apply, aliased output ---------------------
def _bn_apply_kernel(y_ref, part_ref, gb_ref, out_ref, *, inv_count, eps):
    """y_ref    : (B, Cout, Ho*Wo)  f32 conv block
       part_ref : (G, Cout, 2)      f32 all pass-1 partials (tiny, constant block)
       gb_ref   : (Cout, 2)         f32 [gamma, beta] with channel on sublanes
       out_ref  : (B, Cout, Ho*Wo)  f32, same HBM buffer as y (input_output_aliases)
    Scale/shift are recomputed per step (O(Cout) work) so the result is correct even when
    the grid is sharded across v7x TensorCores (no shared scratch needed).
    """
    tot = jnp.sum(part_ref[...], axis=0)                  # (Cout, 2)
    mu = tot[:, 0:1] * inv_count                          # (Cout, 1)
    var = tot[:, 1:2] * inv_count - mu * mu               # biased variance (training-mode BN)
    scale = gb_ref[:, 0:1] * jax.lax.rsqrt(var + eps)     # (Cout, 1)
    shift = gb_ref[:, 1:2] - mu * scale
    # per-channel (per-sublane) broadcast across the lane-dense Ho*Wo axis
    out_ref[...] = y_ref[...] * scale[None] + shift[None]


# --------------------- wrapper: NCHW in / NCHW out, PyTorch-layout weights ---------------------
@functools.partial(jax.jit, static_argnames=("stride", "padding"))
def relu_conv_bn_forward(x_nchw, conv_w, gamma, beta, *, stride, padding):
    N, C, H, W = x_nchw.shape
    Cout, Cin, K, K2 = conv_w.shape
    assert Cin == C and K == K2
    s, p = stride, padding
    Ho = (H + 2 * p - K) // s + 1
    Wo = (W + 2 * p - K) // s + 1
    HoWo = Ho * Wo
    CKK = C * K * K

    # ReLU in f32 in the wrapper (v5e has no bf16 VALU; fuses into the XLA prep), then bf16.
    xr = jnp.maximum(x_nchw, 0.0).astype(jnp.bfloat16)

    # im2col patch extraction (exact identity-kernel conv): (N, Cin*K*K, Ho, Wo), feature
    # index = cin*K*K + kh*K + kw. Handles stride & zero padding -> no strided slices in-kernel.
    patches = jax.lax.conv_general_dilated_patches(
        xr, filter_shape=(K, K), window_strides=(s, s),
        padding=[(p, p), (p, p)],
        dimension_numbers=("NCHW", "OIHW", "NCHW"))
    patches = patches.reshape(N, CKK, HoWo)                       # lane dim = Ho*Wo (lane-dense)

    # PyTorch (Cout, Cin, kh, kw) -> (Cout, Cin*K*K): rows already match the patch feature order.
    w_flat = conv_w.reshape(Cout, CKK).astype(jnp.bfloat16)
    gb = jnp.stack([gamma, beta], axis=1).astype(jnp.float32)     # (Cout, 2), channel on sublanes

    # Batch blocking: keep >= 2 grid steps so both v7x TensorCores get work; multiple images
    # per step amortize fixed per-step overhead on all generations.
    if N >= 2 and N % 2 == 0:
        G, B = 2, N // 2
    else:
        G, B = N, 1

    kernel1 = functools.partial(_conv_stats_kernel, B=B)
    y, part = pl.pallas_call(
        kernel1,
        grid=(G,),
        out_shape=(jax.ShapeDtypeStruct((N, Cout, HoWo), jnp.float32),
                   jax.ShapeDtypeStruct((G, Cout, 2), jnp.float32)),
        in_specs=[pl.BlockSpec((B, CKK, HoWo), lambda g: (g, 0, 0)),
                  pl.BlockSpec((Cout, CKK), lambda g: (0, 0))],
        out_specs=(pl.BlockSpec((B, Cout, HoWo), lambda g: (g, 0, 0)),
                   pl.BlockSpec((1, Cout, 2), lambda g: (g, 0, 0))),
        compiler_params=pltpu.CompilerParams(dimension_semantics=("parallel",)),
    )(patches, w_flat)

    kernel2 = functools.partial(_bn_apply_kernel, inv_count=1.0 / (N * HoWo), eps=EPS)
    out = pl.pallas_call(
        kernel2,
        grid=(G,),
        out_shape=jax.ShapeDtypeStruct((N, Cout, HoWo), jnp.float32),
        in_specs=[pl.BlockSpec((B, Cout, HoWo), lambda g: (g, 0, 0)),
                  pl.BlockSpec((G, Cout, 2), lambda g: (0, 0, 0)),
                  pl.BlockSpec((Cout, 2), lambda g: (0, 0))],
        out_specs=pl.BlockSpec((B, Cout, HoWo), lambda g: (g, 0, 0)),
        input_output_aliases={0: 0},                 # write the result in-place over y
        compiler_params=pltpu.CompilerParams(dimension_semantics=("parallel",)),
    )(y, part, gb)

    # (N, Cout, Ho*Wo) is already flattened NCHW -> contiguous reshape, zero relayout.
    return out.reshape(N, Cout, Ho, Wo)


# --------------------- pure-JAX reference (NCHW, mirrors the PyTorch module) ---------------------
def reference_nchw(x, conv_w, gamma, beta, *, stride, padding):
    h = jnp.maximum(x, 0.0)
    h = jax.lax.conv_general_dilated(
        h, conv_w, (stride, stride), [(padding, padding), (padding, padding)],
        dimension_numbers=("NCHW", "OIHW", "NCHW"),
        precision=jax.lax.Precision.HIGHEST)
    mu = jnp.mean(h, axis=(0, 2, 3), keepdims=True)
    var = jnp.mean((h - mu) ** 2, axis=(0, 2, 3), keepdims=True)
    return ((h - mu) * jax.lax.rsqrt(var + EPS) * gamma[None, :, None, None]
            + beta[None, :, None, None])


if __name__ == "__main__":
    key = jax.random.PRNGKey(0)

    # (C_in, C_out, H, W, kernel_size, stride, padding)
    cfgs = [
        (8, 8, 16, 16, 3, 1, 1),    # 3x3, stride 1
        (8, 16, 16, 16, 1, 1, 0),   # 1x1 "preprocess" ReLUConvBN
        (8, 16, 16, 16, 3, 2, 1),   # 3x3, stride 2 (reduction cell)
    ]

    N = 2
    for idx, (Cin, Cout, H, W, K, s, p) in enumerate(cfgs):
        kx, kwgt = jax.random.split(jax.random.fold_in(key, idx))
        x_nchw = jax.random.normal(kx, (N, Cin, H, W), jnp.float32)
        conv_w = 0.2 * jax.random.normal(kwgt, (Cout, Cin, K, K), jnp.float32)
        gamma = jnp.ones((Cout,), jnp.float32)    # BatchNorm affine init
        beta = jnp.zeros((Cout,), jnp.float32)

        out = relu_conv_bn_forward(x_nchw, conv_w, gamma, beta, stride=s, padding=p)
        out = jax.block_until_ready(out)

        ref = reference_nchw(x_nchw, conv_w, gamma, beta, stride=s, padding=p)
        # NOTE: inputs/weights run in bf16 with f32 MXU accumulation -> ~1e-2-level error
        # vs the f32 HIGHEST-precision reference; covered by this tolerance.
        np.testing.assert_allclose(np.asarray(out), np.asarray(ref), atol=2e-2, rtol=2e-2)

    print("KERNEL_OK")
</pallas_src>

<mosaic_0001>
module attributes {stable_mosaic.version = 11 : i64} {
  func.func @_conv_stats_kernel(%arg0: i32, %arg1: memref<1x72x256xbf16, #tpu.memory_space<vmem>>, %arg2: memref<8x72xbf16, #tpu.memory_space<vmem>>, %arg3: memref<1x8x256xf32, #tpu.memory_space<vmem>>, %arg4: memref<1x8x2xf32, #tpu.memory_space<vmem>>) attributes {dimension_semantics = [#tpu.dimension_semantics<parallel>], iteration_bounds = array<i64: 2>, scalar_prefetch = 0 : i64, scratch_operands = 0 : i64, tpu.core_type = #tpu.core_type<tc>, window_params = [{transform_indices = @transform_0, window_bounds = array<i64: 1, 72, 256>}, {pipeline_mode = #tpu.pipeline_mode<synchronous>, transform_indices = @transform_1, window_bounds = array<i64: 8, 72>}, {transform_indices = @transform_2, window_bounds = array<i64: 1, 8, 256>}, {transform_indices = @transform_3, window_bounds = array<i64: 1, 8, 2>}]} {
    %cst = arith.constant 0.000000e+00 : f32
    %0 = vector.broadcast %cst : f32 to vector<8x1xf32>
    %cst_0 = arith.constant 0.000000e+00 : f32
    %1 = vector.broadcast %cst_0 : f32 to vector<8x1xf32>
    %c0 = arith.constant 0 : index
    %c0_1 = arith.constant 0 : index
    %2 = vector.load %arg2[%c0, %c0_1] : memref<8x72xbf16, #tpu.memory_space<vmem>>, vector<8x72xbf16>
    %c0_2 = arith.constant 0 : index
    %c0_3 = arith.constant 0 : index
    %c0_4 = arith.constant 0 : index
    %3 = vector.load %arg1[%c0_2, %c0_3, %c0_4] : memref<1x72x256xbf16, #tpu.memory_space<vmem>>, vector<1x72x256xbf16>
    %4 = vector.shape_cast %3 : vector<1x72x256xbf16> to vector<72x256xbf16>
    %cst_5 = arith.constant dense<0.000000e+00> : vector<8x256xf32>
    %5 = tpu.matmul %2, %4, %cst_5 {dimension_numbers = #tpu.dot_dimension_numbers<[1], [0], [0], [1], [0, 0, 1, 1], [], []>} : vector<8x72xbf16>, vector<72x256xbf16>, vector<8x256xf32> -> vector<8x256xf32>
    %c0_6 = arith.constant 0 : index
    %c0_7 = arith.constant 0 : index
    %c0_8 = arith.constant 0 : index
    %6 = vector.load %arg3[%c0_6, %c0_7, %c0_8] : memref<1x8x256xf32, #tpu.memory_space<vmem>>, vector<1x8x256xf32>
    %7 = vector.shape_cast %6 : vector<1x8x256xf32> to vector<8x256xf32>
    %8 = vector.shape_cast %5 : vector<8x256xf32> to vector<1x8x256xf32>
    tpu.vector_store %arg3[%c0_6, %c0_7, %c0_8], %8 {strides = array<i32>} : memref<1x8x256xf32, #tpu.memory_space<vmem>>, vector<1x8x256xf32>,
    %cst_9 = arith.constant dense<0.000000e+00> : vector<8xf32>
    %9 = vector.multi_reduction <add>, %5, %cst_9 [1] : vector<8x256xf32> to vector<8xf32>
    %10 = vector.shape_cast %9 : vector<8xf32> to vector<8x1xf32>
    %11 = arith.addf %0, %10 : vector<8x1xf32>
    %12 = arith.mulf %5, %5 : vector<8x256xf32>
    %cst_10 = arith.constant dense<0.000000e+00> : vector<8xf32>
    %13 = vector.multi_reduction <add>, %12, %cst_10 [1] : vector<8x256xf32> to vector<8xf32>
    %14 = vector.shape_cast %13 : vector<8xf32> to vector<8x1xf32>
    %15 = arith.addf %1, %14 : vector<8x1xf32>
    %16 = tpu.concatenate %11, %15 in 1 : vector<8x1xf32>, vector<8x1xf32> -> vector<8x2xf32>
    %17 = vector.shape_cast %16 : vector<8x2xf32> to vector<1x8x2xf32>
    %c0_11 = arith.constant 0 : index
    %c0_12 = arith.constant 0 : index
    %c0_13 = arith.constant 0 : index
    %18 = vector.load %arg4[%c0_11, %c0_12, %c0_13] : memref<1x8x2xf32, #tpu.memory_space<vmem>>, vector<1x8x2xf32>
    tpu.vector_store %arg4[%c0_11, %c0_12, %c0_13], %17 {strides = array<i32>} : memref<1x8x2xf32, #tpu.memory_space<vmem>>, vector<1x8x2xf32>,
    return
  }
  func.func @transform_0(%arg0: i32) -> (i32, i32, i32) {
    %c0_i32 = arith.constant 0 : i32
    %c0_i32_0 = arith.constant 0 : i32
    %c0_i32_1 = arith.constant 0 : i32
    return %arg0, %c0_i32, %c0_i32_0 : i32, i32, i32
  }
  func.func @transform_1(%arg0: i32) -> (i32, i32) {
    %c0_i32 = arith.constant 0 : i32
    %c0_i32_0 = arith.constant 0 : i32
    %c0_i32_1 = arith.constant 0 : i32
    return %c0_i32, %c0_i32_0 : i32, i32
  }
  func.func @transform_2(%arg0: i32) -> (i32, i32, i32) {
    %c0_i32 = arith.constant 0 : i32
    %c0_i32_0 = arith.constant 0 : i32
    %c0_i32_1 = arith.constant 0 : i32
    return %arg0, %c0_i32, %c0_i32_0 : i32, i32, i32
  }
  func.func @transform_3(%arg0: i32) -> (i32, i32, i32) {
    %c0_i32 = arith.constant 0 : i32
    %c0_i32_0 = arith.constant 0 : i32
    %c0_i32_1 = arith.constant 0 : i32
    return %arg0, %c0_i32, %c0_i32_0 : i32, i32, i32
  }
}

module attributes {stable_mosaic.version = 11 : i64} {
  func.func @_bn_apply_kernel(%arg0: i32, %arg1: memref<1x8x256xf32, #tpu.memory_space<vmem>>, %arg2: memref<2x8x2xf32, #tpu.memory_space<vmem>>, %arg3: memref<8x2xf32, #tpu.memory_space<vmem>>, %arg4: memref<1x8x256xf32, #tpu.memory_space<vmem>>) attributes {dimension_semantics = [#tpu.dimension_semantics<parallel>], iteration_bounds = array<i64: 2>, scalar_prefetch = 0 : i64, scratch_operands = 0 : i64, tpu.core_type = #tpu.core_type<tc>, window_params = [{transform_indices = @transform_0, window_bounds = array<i64: 1, 8, 256>}, {pipeline_mode = #tpu.pipeline_mode<synchronous>, transform_indices = @transform_1, window_bounds = array<i64: 2, 8, 2>}, {pipeline_mode = #tpu.pipeline_mode<synchronous>, transform_indices = @transform_2, window_bounds = array<i64: 8, 2>}, {transform_indices = @transform_3, window_bounds = array<i64: 1, 8, 256>}]} {
    %c0 = arith.constant 0 : index
    %c0_0 = arith.constant 0 : index
    %c0_1 = arith.constant 0 : index
    %0 = vector.load %arg2[%c0, %c0_0, %c0_1] : memref<2x8x2xf32, #tpu.memory_space<vmem>>, vector<2x8x2xf32>
    %cst = arith.constant dense<0.000000e+00> : vector<8x2xf32>
    %1 = vector.multi_reduction <add>, %0, %cst [0] : vector<2x8x2xf32> to vector<8x2xf32>
    %2 = vector.extract_strided_slice %1 {offsets = [0, 0], sizes = [8, 1], strides = [1, 1]} : vector<8x2xf32> to vector<8x1xf32>
    %cst_2 = arith.constant 0.001953125 : f32
    %3 = vector.broadcast %cst_2 : f32 to vector<8x1xf32>
    %4 = arith.mulf %2, %3 : vector<8x1xf32>
    %5 = vector.extract_strided_slice %1 {offsets = [0, 1], sizes = [8, 1], strides = [1, 1]} : vector<8x2xf32> to vector<8x1xf32>
    %cst_3 = arith.constant 0.001953125 : f32
    %6 = vector.broadcast %cst_3 : f32 to vector<8x1xf32>
    %7 = arith.mulf %5, %6 : vector<8x1xf32>
    %8 = arith.mulf %4, %4 : vector<8x1xf32>
    %9 = arith.subf %7, %8 : vector<8x1xf32>
    %c0_4 = arith.constant 0 : index
    %c0_5 = arith.constant 0 : index
    %10 = vector.load %arg3[%c0_4, %c0_5] : memref<8x2xf32, #tpu.memory_space<vmem>>, vector<8x1xf32>
    %cst_6 = arith.constant 9.99999974E-6 : f32
    %11 = vector.broadcast %cst_6 : f32 to vector<8x1xf32>
    %12 = arith.addf %9, %11 : vector<8x1xf32>
    %13 = math.rsqrt %12 : vector<8x1xf32>
    %14 = arith.mulf %10, %13 : vector<8x1xf32>
    %c0_7 = arith.constant 0 : index
    %c1 = arith.constant 1 : index
    %15 = vector.load %arg3[%c0_7, %c1] : memref<8x2xf32, #tpu.memory_space<vmem>>, vector<8x1xf32>
    %16 = arith.mulf %4, %14 : vector<8x1xf32>
    %17 = arith.subf %15, %16 : vector<8x1xf32>
    %c0_8 = arith.constant 0 : index
    %c0_9 = arith.constant 0 : index
    %c0_10 = arith.constant 0 : index
    %18 = vector.load %arg1[%c0_8, %c0_9, %c0_10] : memref<1x8x256xf32, #tpu.memory_space<vmem>>, vector<1x8x256xf32>
    %19 = vector.shape_cast %14 : vector<8x1xf32> to vector<1x8x1xf32>
    %20 = vector.broadcast %19 : vector<1x8x1xf32> to vector<1x8x256xf32>
    %21 = arith.mulf %18, %20 : vector<1x8x256xf32>
    %22 = vector.shape_cast %17 : vector<8x1xf32> to vector<1x8x1xf32>
    %23 = vector.broadcast %22 : vector<1x8x1xf32> to vector<1x8x256xf32>
    %24 = arith.addf %21, %23 : vector<1x8x256xf32>
    %c0_11 = arith.constant 0 : index
    %c0_12 = arith.constant 0 : index
    %c0_13 = arith.constant 0 : index
    %25 = vector.load %arg4[%c0_11, %c0_12, %c0_13] : memref<1x8x256xf32, #tpu.memory_space<vmem>>, vector<1x8x256xf32>
    tpu.vector_store %arg4[%c0_11, %c0_12, %c0_13], %24 {strides = array<i32>} : memref<1x8x256xf32, #tpu.memory_space<vmem>>, vector<1x8x256xf32>,
    return
  }
  func.func @transform_0(%arg0: i32) -> (i32, i32, i32) {
    %c0_i32 = arith.constant 0 : i32
    %c0_i32_0 = arith.constant 0 : i32
    %c0_i32_1 = arith.constant 0 : i32
    return %arg0, %c0_i32, %c0_i32_0 : i32, i32, i32
  }
  func.func @transform_1(%arg0: i32) -> (i32, i32, i32) {
    %c0_i32 = arith.constant 0 : i32
    %c0_i32_0 = arith.constant 0 : i32
    %c0_i32_1 = arith.constant 0 : i32
    %c0_i32_2 = arith.constant 0 : i32
    return %c0_i32, %c0_i32_0, %c0_i32_1 : i32, i32, i32
  }
  func.func @transform_2(%arg0: i32) -> (i32, i32) {
    %c0_i32 = arith.constant 0 : i32
    %c0_i32_0 = arith.constant 0 : i32
    %c0_i32_1 = arith.constant 0 : i32
    return %c0_i32, %c0_i32_0 : i32, i32
  }
  func.func @transform_3(%arg0: i32) -> (i32, i32, i32) {
    %c0_i32 = arith.constant 0 : i32
    %c0_i32_0 = arith.constant 0 : i32
    %c0_i32_1 = arith.constant 0 : i32
    return %arg0, %c0_i32, %c0_i32_0 : i32, i32, i32
  }
}

</mosaic_0001>

<bundles_post_ra>
// kernel: relu_conv_bn_forward.3
= control target key start
LH: loop header
LB: loop body
LE: loop exit
PB: predicated region body
PF: predicated region fallthrough
CT: control target
= control target key end

     0   :  { %s332_s12 = smov 0   ;;  %s362_s0 = inlined_call_operand.vmem [shape: f32[2,8,256], index: 0, kind: input, shape index: {}, may-alias: {0,3}]   ;;  %s363_s1 = inlined_call_operand.vmem [shape: f32[2,8,2], index: 1, kind: input, shape index: {}]   ;;  %s364_s2 = inlined_call_operand.vmem [shape: f32[8,2], index: 2, kind: input, shape index: {}]   ;;  %s365_s3 = inlined_call_operand.vmem [shape: f32[2,8,256], index: 3, kind: output, shape index: {}, may-alias: {0,3}]  }
   0x1 LB: > { %s271_s13 = sadd.s32 4294967295, %s306_s12   ;;  %p275_p0 = scmp.ge.s32.totalorder %s306_s12, 1  ;;  %s306_s12 = sphi %s332_s12, %s13_s12  }
   0x2   : > { %p137_p1 = scmp.lt.s32.totalorder %s306_s12, 3 }
   0x4   : > { %p138_p2 = pnand %p275_p0, %p137_p1 }
   0x5   : > { %v171_v0 = vld [vmem:[%s363_s1] sm:$0xff] (!%p138_p2)  ;;  %v172_v1 = vld [vmem:[%s363_s1 + $0x8] sm:$0xff] (!%p138_p2)  ;;  %vm173_vm0 = vcmask (!%p138_p2), 15360   ;;  %s308_s18 = smov (!%p138_p2), 1   ;;  %v309_v10 = vmov (!%p138_p2), 0   ;;  %s310_s19 = smov (!%p138_p2), 127  }
   0x6   : > { %141 = sbr.rel (%p138_p2) target bundleno = 510 (0x1fe), region = 32  ;;  %v174_v2 = vsel (!%p138_p2), %vm173_vm0, %v171_v0, 0.0  ;;  %v175_v3 = vsel (!%p138_p2), %vm173_vm0, %v172_v1, 0.0  ;;  %296 = vset.pattern.permute.xlu1 (!%p138_p2), %v309_v10  ;;  %v311_v12 = vmov (!%p138_p2), 1   ;;  %v184_v13 = vld [vmem:[%s364_s2] sm:$0xff] (!%p138_p2)  ;;  %p161_p3 = scmp.lt.s32.totalorder (!%p138_p2), %s271_s13, 1 }
   0x7   : > { %v176_v4 = vadd.f32 (!%p138_p2), %v175_v3, %v174_v2  ;;  %297 = vset.pattern.permute.xlu0 (!%p138_p2), %v311_v12 }
   0x9   : > { %v177_v5 = vmul.f32 (!%p138_p2), 0.001953125, %v176_v4 }
   0xb   : > { %v178_v6 = vmul.f32 (!%p138_p2), %v177_v5, %v177_v5 }
   0xd   : > { %180 = vrot.lane.b32.xlu0 %v178_v6, %s308_s18  ;;  %s367_s13 = smov (!%p161_p3, %s271_s13), 1 }
   0xe   : > { %s282_s22 = sshll.u32 %s367_s13, 4 }
   0xf   : > { %s165_s25 = scalar_lea.vmem %s362_s0, %s282_s22  ;;  %s170_s28 = scalar_lea.vmem %s365_s3, %s282_s22 }
  0x10   : > { %v198_v20 = vld [vmem:[%s165_s25] sm:$0xff]  ;;  %v199_v21 = vld [vmem:[%s165_s25 + $0x8] sm:$0xff] }
  0x7f   : > { %v181_v7 = vpop.permute.xlu0 %180 }
  0x80   : > { %v183_v8 = vsub.f32 %v177_v5, %v181_v7 }
  0x82   : > { %v185_v9 = vadd.f32 1e-05, %v183_v8 }
  0x84   : > { %298 = vrsqrt.f32 %v185_v9 }
  0x8e   : > { %v299_v11 = vpop.eup %298 }
  0x8f   : > { %188 = vrot.lane.b32.xlu0 %v299_v11, %s310_s19 }
 0x101   : > { %v189_v14 = vpop.permute.xlu0 %188 }
 0x102   : > { %v191_v15 = vmul.f32 %v189_v14, %v184_v13 }
 0x104   : > { %v192_v16 = vmul.f32 %v191_v15, %v177_v5 }
 0x106   : > { %194 = vrot.lane.b32.xlu1 %v192_v16, %s308_s18 }
 0x10a   : > { %202 = vperm.xlu1 %296, %v191_v15  }
 0x178   : > { %v195_v17 = vpop.permute.xlu1 %194 }
 0x179   : > { %v197_v18 = vsub.f32 %v184_v13, %v195_v17 }
 0x17b   : > { %209 = vperm.xlu0 %297, %v197_v18  }
 0x189   : > { %v203_v19 = vpop.permute.xlu1 %202 }
 0x18a   : > { %v205_v22 = vmul.f32 %v203_v19, %v198_v20  ;;  %v206_v23 = vmul.f32 %v203_v19, %v199_v21 }
 0x1fa   : > { %v210_v24 = vpop.permute.xlu0 %209 }
 0x1fb   : > { %v212_v25 = vadd.f32 %v210_v24, %v205_v22  ;;  %v213_v26 = vadd.f32 %v210_v24, %v206_v23 }
 0x1fd   : > { %214 = vst [vmem:[%s170_s28] sm:$0xff] %v212_v25  ;;  %215 = vst [vmem:[%s170_s28 + $0x8] sm:$0xff] %v213_v26 }
 0x1fe PF: > { %s13_s12 = sadd.s32 1, %s306_s12  }
 0x1ff   : > { %p10_p4 = scmp.ge.s32.totalorder %s13_s12, 4  }
 0x201   :  { %12 = sbr.rel (!%p10_p4) target bundleno = 1 (0x1), region = 62 }

// kernel: relu_conv_bn_forward.2
= control target key start
LH: loop header
LB: loop body
LE: loop exit
PB: predicated region body
PF: predicated region fallthrough
CT: control target
= control target key end

     0   :  { %s469_s12 = smov 0   ;;  %s497_s0 = inlined_call_operand.vmem [shape: bf16[2,72,256], index: 0, kind: input, shape index: {}]   ;;  %s498_s1 = inlined_call_operand.vmem [shape: bf16[8,72], index: 1, kind: input, shape index: {}]   ;;  %s499_s2 = inlined_call_operand.vmem [shape: f32[2,8,256], index: 2, kind: output, shape index: {0}]   ;;  %s500_s3 = inlined_call_operand.vmem [shape: f32[2,8,2], index: 3, kind: output, shape index: {1}]  }
   0x1 LB: > { %s392_s13 = sadd.s32 4294967295, %s446_s12   ;;  %p396_p0 = scmp.ge.s32.totalorder %s446_s12, 1  ;;  %s446_s12 = sphi %s469_s12, %s14_s12  }
   0x2   : > { %p140_p1 = scmp.lt.s32.totalorder %s446_s12, 3 }
   0x4   : > { %p141_p2 = pnand %p396_p0, %p140_p1 }
   0x5   : > { %p168_p3 = scmp.lt.s32.totalorder (!%p141_p2), %s392_s13, 1  ;;  %v448_v0 = vmov (!%p141_p2), 0   ;;  %vm242_vm0 = vcmask (!%p141_p2), 1043456   ;;  %v183_v13 = vld [vmem:[%s498_s1] sm:$0xf] (!%p141_p2)  ;;  %vm238_vm1 = vcmask (!%p141_p2), 588800  }
   0x6   : > { %144 = sbr.rel (%p141_p2) target bundleno = 401 (0x191), region = 28  ;;  %281 = vmatprep.mubr.bf16.mxu0 (!%p141_p2), %v448_v0  ;;  %vm302_vm2 = vcmask (!%p141_p2), 7168   ;;  %vm304_vm3 = vcmask (!%p141_p2), 15360  }
   0xd   : > { %s502_s13 = smov (!%p168_p3, %s392_s13), 1 }
   0xe   : > { %s416_s14 = smul.u32 72, %s502_s13  ;;  %s415_s20 = sshll.u32 %s502_s13, 4 }
   0xf   : > { %s177_s23 = scalar_lea.vmem %s499_s2, %s415_s20  ;;  %s400_s24 = sshll.u32 %s502_s13, 3 }
  0x10   : > { %s172_s17 = scalar_lea.vmem %s497_s0, %s416_s14  ;;  %s181_s27 = scalar_lea.vmem %s500_s3, %s400_s24 }
  0x11   : > { %v426_v1 = vld [vmem:[%s172_s17 + $0x4] ss:$8 sps:$4 sm:$0xff]   ;;  %v428_v2 = vld [vmem:[%s172_s17] ss:$8 sps:$4 sm:$0xff]   ;;  %v429_v3 = vld [vmem:[%s172_s17 + $0x14] ss:$8 sps:$4 sm:$0xff]  }
  0x12   : > { %249 = vmatprep.subr.bf16.mxu0 %v426_v1  ;;  %v431_v4 = vld [vmem:[%s172_s17 + $0x10] ss:$8 sps:$4 sm:$0xff]   ;;  %v432_v5 = vld [vmem:[%s172_s17 + $0x24] ss:$8 sps:$4 sm:$0xff]   ;;  %v434_v6 = vld [vmem:[%s172_s17 + $0x20] ss:$8 sps:$4 sm:$0xff]  }
  0x13   : > { %250 = vmatpush1.bf16.msra.mxu0 %v428_v2  ;;  %v435_v7 = vld [vmem:[%s172_s17 + $0x34] ss:$8 sps:$4 sm:$0xff]   ;;  %v192_v8 = vld [vmem:[%s172_s17 + $0x40] sm:$0xff]  ;;  %v437_v9 = vld [vmem:[%s172_s17 + $0x30] ss:$8 sps:$4 sm:$0xff]  }
  0x14   : > { %251 = vmatprep.subr.bf16.mxu0 %v429_v3  ;;  %v410_v10 = vcombine.high %v192_v8, %v192_v8  ;;  %v409_v11 = vcombine.low %v192_v8, %v192_v8 }
  0x16   : > { %v244_v12 = vsel %vm242_vm0, %v409_v11, 0 }
  0x17   : > { %252 = vmatpush1.bf16.msra.mxu0 %v431_v4 }
  0x18   : > { %253 = vmatprep.subr.bf16.mxu0 %v432_v5 }
  0x1b   : > { %254 = vmatpush1.bf16.msra.mxu0 %v434_v6 }
  0x1c   : > { %255 = vmatprep.subr.bf16.mxu0 %v435_v7 }
  0x1f   : > { %256 = vmatpush1.bf16.msra.mxu0 %v437_v9 }
  0x20   : > { %411 = vmatprep.subr.msk.bf16.mxu0 %vm242_vm0, %v410_v10 }
  0x23   : > { %258 = vmatpush1.bf16.msra.mxu0 %v244_v12 }
  0x26   : > { %412 = vmatmul.mubr.msk.bf16.vlgmr.msra.gmra.mrb[0].mxu0 %vm238_vm1, %v183_v13 }
  0xf9   : > { %v283_v14 = vpop.f32.mrb[0].mxu0 }
  0xfa   : > { %290 = vst [vmem:[%s177_s23] sm:$0xff] %v283_v14  ;;  %v285_v15 = vpop.f32.mrb[1].mxu0  ;;  %v296_v16 = vmul.f32 %v283_v14, %v283_v14 }
  0xfb   : > { %291 = vst [vmem:[%s177_s23 + $0x8] sm:$0xff] %v285_v15  ;;  %v287_v17 = vpop.f32.mrb[2].mxu0  ;;  %v292_v18 = vadd.f32 %v285_v15, %v283_v14  ;;  %v297_v19 = vmul.f32 %v285_v15, %v285_v15 }
  0xfc   : > { %v288_v20 = vpop.f32.mrb[3].mxu0 }
  0xfd   : > { %293 = vadd.xlane.f32.xlu0 %v292_v18  ;;  %v298_v21 = vadd.f32 %v297_v19, %v296_v16 }
 0x101   : > { %299 = vadd.xlane.f32.xlu0 %v298_v21 }
 0x18a   : > { %v294_v22 = vpop.xlane.xlu0 %293 }
 0x18e   : > { %v300_v23 = vpop.xlane.xlu0 %299 }
 0x18f   : > { %v303_v24 = vsel %vm302_vm2, %v294_v22, %v300_v23 }
 0x190   : > { %305 = vst.msk [vmem:[%s181_s27] sm:$0xff] %vm304_vm3, %v303_v24 }
 0x191 PF: > { %s14_s12 = sadd.s32 1, %s446_s12  }
 0x192   : > { %p11_p4 = scmp.ge.s32.totalorder %s14_s12, 4  }
 0x194   :  { %13 = sbr.rel (!%p11_p4) target bundleno = 1 (0x1), region = 70 }

</bundles_post_ra>
